<compile_context>
chip_gen: v5e
topology: v5e:2x2
jax: 0.10.0
libtpu: 0.0.40
codegen_flags: <defaults>
</compile_context>

<pallas_src>
import functools
import numpy as np
import jax
import jax.numpy as jnp
from jax.experimental import pallas as pl
from jax.experimental.pallas import tpu as pltpu


# --------------------- fused conv + pool + head kernel -----------------------
def fused_topo_kernel(adj_ref, xw1_ref, b1_ref, topo_ref, wt_ref, bt_ref,
                      wfa_ref, wfb_ref, bf_ref, w2p_ref, b2p_ref,
                      out_ref, acc_ref, *, nodes_per_graph, tk):
    """grid = (node-row tiles, Â-column tiles).
    Streams Â tiles, accumulates Â @ XW1 in f32; the k==last epilogue applies
    bias+relu, segmented max-pool, topo/final/classifier matmuls and log_softmax,
    emitting a lane-dense [graphs_per_tile, 128] block."""
    k = pl.program_id(1)
    f32 = jnp.float32

    @pl.when(k == 0)
    def _():
        acc_ref[...] = jnp.zeros_like(acc_ref)

    # bf16 operands, f32 accumulation on the MXU.  XW1 is fully resident; slice
    # the k-th row block (start is a multiple of the 128-lane tile by construction).
    koff = pl.multiple_of(k * tk, 128)
    acc_ref[...] += jnp.dot(adj_ref[...], xw1_ref[pl.ds(koff, tk), :],
                            preferred_element_type=f32)

    @pl.when(k == pl.num_programs(1) - 1)
    def _():
        h = jnp.maximum(acc_ref[...] + b1_ref[...], 0.0)             # [tm, H] f32
        tm, H = h.shape
        gt = tm // nodes_per_graph

        # segmented global-max-pool: graphs are contiguous equal-size node blocks.
        pooled = jnp.max(h.reshape(gt, nodes_per_graph, H), axis=1)  # [gt, H]

        # topo branch: relu(topo_lin(topo_feats))
        topo_x = jnp.maximum(
            jnp.dot(topo_ref[...], wt_ref[...], preferred_element_type=f32)
            + bt_ref[...], 0.0)                                      # [gt, H]

        # final_lin on concat([pooled, topo_x]) == pooled @ Wf_a + topo_x @ Wf_b
        xf = jnp.maximum(
            jnp.dot(pooled, wfa_ref[...], preferred_element_type=f32)
            + jnp.dot(topo_x, wfb_ref[...], preferred_element_type=f32)
            + bf_ref[...], 0.0)                                      # [gt, H]

        # classifier padded to 128 lanes (pad cols: zero weight, -1e30 bias),
        # then log_softmax; the store below is lane-dense (128 wide).
        logits = (jnp.dot(xf, w2p_ref[...], preferred_element_type=f32)
                  + b2p_ref[...])                                    # [gt, 128]
        m = jnp.max(logits, axis=-1, keepdims=True)
        z = logits - m
        lse = jnp.log(jnp.sum(jnp.exp(z), axis=-1, keepdims=True))
        out_ref[...] = z - lse                                       # [gt, 128]


def topo_model_forward(adj_norm, x, topo_feats,
                       w1, b1, wt, bt, wf, bf, w2, b2,
                       *, nodes_per_graph, tm=None, tk=None, c_pad=128):
    N, _ = x.shape
    H = w1.shape[1]
    C = w2.shape[1]
    G = N // nodes_per_graph

    # tile defaults: collapse to a single grid step at small N, grow tiles at scale.
    if tm is None:
        tm = N if N <= 256 else max(nodes_per_graph,
                                    (256 // nodes_per_graph) * nodes_per_graph)
    if tk is None:
        tk = N if N <= 512 else 512

    # no silent tail dropping: assert tiling divides the problem.
    assert N % nodes_per_graph == 0
    assert N % tm == 0 and N % tk == 0, "pad N to a multiple of (tm, tk)"
    assert tm % nodes_per_graph == 0
    assert tm % 8 == 0 and (tk % 128 == 0 or tk == N)
    gt = tm // nodes_per_graph
    assert gt % 8 == 0 or gt == G

    # algebra reorder: XW1 = X @ W1 once in f32, then bf16 for the streamed matmul.
    xw1 = jnp.dot(x, w1, preferred_element_type=jnp.float32).astype(jnp.bfloat16)
    adj_bf16 = adj_norm.astype(jnp.bfloat16)

    wfa, wfb = wf[:H, :], wf[H:, :]                   # split concat halves
    w2p = jnp.zeros((H, c_pad), jnp.float32).at[:, :C].set(w2)
    b2p = jnp.full((1, c_pad), -1e30, jnp.float32).at[0, :C].set(b2)

    grid = (N // tm, N // tk)
    kernel = functools.partial(fused_topo_kernel,
                               nodes_per_graph=nodes_per_graph, tk=tk)
    out = pl.pallas_call(
        kernel,
        out_shape=jax.ShapeDtypeStruct((G, c_pad), jnp.float32),
        grid_spec=pltpu.PrefetchScalarGridSpec(
            num_scalar_prefetch=0,
            grid=grid,
            in_specs=[
                pl.BlockSpec((tm, tk), lambda i, k: (i, k)),    # Â tile (bf16 stream)
                pl.BlockSpec((N, H), lambda i, k: (0, 0)),      # XW1 (bf16, resident)
                pl.BlockSpec((1, H), lambda i, k: (0, 0)),      # b1
                pl.BlockSpec((gt, 5), lambda i, k: (i, 0)),     # topo feats
                pl.BlockSpec((5, H), lambda i, k: (0, 0)),      # topo_lin W
                pl.BlockSpec((1, H), lambda i, k: (0, 0)),      # topo_lin b
                pl.BlockSpec((H, H), lambda i, k: (0, 0)),      # final_lin W (pooled)
                pl.BlockSpec((H, H), lambda i, k: (0, 0)),      # final_lin W (topo)
                pl.BlockSpec((1, H), lambda i, k: (0, 0)),      # final_lin b
                pl.BlockSpec((H, c_pad), lambda i, k: (0, 0)),  # classifier W (padded)
                pl.BlockSpec((1, c_pad), lambda i, k: (0, 0)),  # classifier b (padded)
            ],
            out_specs=pl.BlockSpec((gt, c_pad), lambda i, k: (i, 0)),
            scratch_shapes=[pltpu.VMEM((tm, H), jnp.float32)],  # Â@XW1 accumulator
        ),
        compiler_params=pltpu.CompilerParams(
            dimension_semantics=("parallel", "arbitrary"),
            vmem_limit_bytes=32 << 20,
        ),
    )(adj_bf16, xw1, b1.reshape(1, -1), topo_feats,
      wt, bt.reshape(1, -1), wfa, wfb, bf.reshape(1, -1), w2p, b2p)
    return out[:, :C]                                 # lane-dense store, slice on host


topo_model_forward_jit = jax.jit(
    topo_model_forward,
    static_argnames=("nodes_per_graph", "tm", "tk", "c_pad"))


# ------------------------------ host glue ------------------------------------
def graph_topo_features(A):
    """numpy replica of extract_graph_features for an undirected simple graph
    given its 0/1 adjacency (no self loops)."""
    n = A.shape[0]
    if n <= 1:
        return np.zeros(5, dtype=np.float32)
    deg = A.sum(axis=1)
    avg_degree = deg.sum() / n
    max_degree = deg.max() if n else 0.0
    degree_centrality = max_degree / (n - 1)
    if n > 2:
        tri = np.diag(A @ A @ A) / 2.0
        possible = deg * (deg - 1) / 2.0
        coeff = np.where(possible > 0, tri / np.maximum(possible, 1e-12), 0.0)
        clustering = coeff.mean()
    else:
        clustering = 0.0
    num_edges = A.sum() / 2.0
    density = 2.0 * num_edges / (n * (n - 1))
    return np.array([avg_degree / 10.0, degree_centrality, clustering,
                     density, float(n) / 100.0], dtype=np.float32)


def gcn_normalized_adjacency(A):
    """Â = D̃^-1/2 (A + I) D̃^-1/2 with D̃ = deg(A + I) — GCNConv default norm."""
    n = A.shape[0]
    A_tilde = A + np.eye(n, dtype=np.float32)
    deg = A_tilde.sum(axis=1)
    d_inv_sqrt = 1.0 / np.sqrt(deg)
    return (d_inv_sqrt[:, None] * A_tilde * d_inv_sqrt[None, :]).astype(np.float32)


if __name__ == "__main__":
    # ---- small, deterministic problem: 16 graphs of 16 nodes each ----
    G = 16
    nodes_per_graph = 16
    N = G * nodes_per_graph          # 256
    F_in = 8                         # args.num_features
    H = 32                           # args.nhid
    C = 4                            # args.num_classes

    # deterministic per-graph random adjacencies (undirected, no self loops)
    rng = np.random.RandomState(0)
    A = np.zeros((N, N), dtype=np.float32)
    for g in range(G):
        s = g * nodes_per_graph
        blk = (rng.rand(nodes_per_graph, nodes_per_graph) < 0.3).astype(np.float32)
        blk = np.triu(blk, 1)
        A[s:s + nodes_per_graph, s:s + nodes_per_graph] = blk + blk.T

    adj_norm = gcn_normalized_adjacency(A)                         # [N, N]
    topo_feats = np.stack([
        graph_topo_features(A[g * nodes_per_graph:(g + 1) * nodes_per_graph,
                              g * nodes_per_graph:(g + 1) * nodes_per_graph])
        for g in range(G)
    ]).astype(np.float32)                                          # [G, 5]

    # ---- deterministic inputs & parameters ----
    key = jax.random.PRNGKey(0)
    keys = jax.random.split(key, 10)
    x = jax.random.normal(keys[0], (N, F_in), dtype=jnp.float32)

    scale = 0.1
    w1 = scale * jax.random.normal(keys[1], (F_in, H), dtype=jnp.float32)   # conv1
    b1 = scale * jax.random.normal(keys[2], (H,), dtype=jnp.float32)
    wt = scale * jax.random.normal(keys[3], (5, H), dtype=jnp.float32)      # topo_lin
    bt = scale * jax.random.normal(keys[4], (H,), dtype=jnp.float32)
    wf = scale * jax.random.normal(keys[5], (2 * H, H), dtype=jnp.float32)  # final_lin
    bf = scale * jax.random.normal(keys[6], (H,), dtype=jnp.float32)
    w2 = scale * jax.random.normal(keys[7], (H, C), dtype=jnp.float32)      # lin2
    b2 = scale * jax.random.normal(keys[8], (C,), dtype=jnp.float32)

    out = topo_model_forward_jit(
        jnp.asarray(adj_norm), x, jnp.asarray(topo_feats),
        w1, b1, wt, bt, wf, bf, w2, b2,
        nodes_per_graph=nodes_per_graph)
    out = jax.block_until_ready(out)

    # ---- pure-JAX f32 reference (validates the bf16 fused-kernel path) ----
    adj_j = jnp.asarray(adj_norm)
    h_ref = jax.nn.relu((adj_j @ x) @ w1 + b1)
    pooled_ref = jnp.max(h_ref.reshape(G, nodes_per_graph, H), axis=1)
    topo_x_ref = jax.nn.relu(jnp.asarray(topo_feats) @ wt + bt)
    xf_ref = jax.nn.relu(jnp.concatenate([pooled_ref, topo_x_ref], axis=1) @ wf + bf)
    ref = jax.nn.log_softmax(xf_ref @ w2 + b2, axis=-1)

    assert out.shape == (G, C)
    assert bool(jnp.all(jnp.isfinite(out)))
    # rows of log_softmax should exp-sum to ~1
    assert bool(jnp.allclose(jnp.sum(jnp.exp(out), axis=-1), 1.0, atol=1e-5))
    # bf16 streamed matmul with f32 accumulation vs f32 reference
    assert bool(jnp.allclose(out, ref, atol=1e-1)), float(jnp.max(jnp.abs(out - ref)))
    print("KERNEL_OK")
</pallas_src>

<mosaic_0001>
module attributes {stable_mosaic.version = 11 : i64} {
  func.func @fused_topo_kernel(%arg0: i32, %arg1: i32, %arg2: memref<256x256xbf16, #tpu.memory_space<vmem>>, %arg3: memref<256x32xbf16, #tpu.memory_space<vmem>>, %arg4: memref<1x32xf32, #tpu.memory_space<vmem>>, %arg5: memref<16x5xf32, #tpu.memory_space<vmem>>, %arg6: memref<5x32xf32, #tpu.memory_space<vmem>>, %arg7: memref<1x32xf32, #tpu.memory_space<vmem>>, %arg8: memref<32x32xf32, #tpu.memory_space<vmem>>, %arg9: memref<32x32xf32, #tpu.memory_space<vmem>>, %arg10: memref<1x32xf32, #tpu.memory_space<vmem>>, %arg11: memref<32x128xf32, #tpu.memory_space<vmem>>, %arg12: memref<1x128xf32, #tpu.memory_space<vmem>>, %arg13: memref<16x128xf32, #tpu.memory_space<vmem>>, %arg14: memref<256x32xf32, #tpu.memory_space<vmem>>) attributes {dimension_semantics = [#tpu.dimension_semantics<parallel>, #tpu.dimension_semantics<arbitrary>], iteration_bounds = array<i64: 1, 1>, scalar_prefetch = 0 : i64, scratch_operands = 1 : i64, tpu.core_type = #tpu.core_type<tc>, window_params = [{transform_indices = @transform_0, window_bounds = array<i64: 256, 256>}, {pipeline_mode = #tpu.pipeline_mode<synchronous>, transform_indices = @transform_1, window_bounds = array<i64: 256, 32>}, {pipeline_mode = #tpu.pipeline_mode<synchronous>, transform_indices = @transform_2, window_bounds = array<i64: 1, 32>}, {transform_indices = @transform_3, window_bounds = array<i64: 16, 5>}, {pipeline_mode = #tpu.pipeline_mode<synchronous>, transform_indices = @transform_4, window_bounds = array<i64: 5, 32>}, {pipeline_mode = #tpu.pipeline_mode<synchronous>, transform_indices = @transform_5, window_bounds = array<i64: 1, 32>}, {pipeline_mode = #tpu.pipeline_mode<synchronous>, transform_indices = @transform_6, window_bounds = array<i64: 32, 32>}, {pipeline_mode = #tpu.pipeline_mode<synchronous>, transform_indices = @transform_7, window_bounds = array<i64: 32, 32>}, {pipeline_mode = #tpu.pipeline_mode<synchronous>, transform_indices = @transform_8, window_bounds = array<i64: 1, 32>}, {pipeline_mode = #tpu.pipeline_mode<synchronous>, transform_indices = @transform_9, window_bounds = array<i64: 32, 128>}, {pipeline_mode = #tpu.pipeline_mode<synchronous>, transform_indices = @transform_10, window_bounds = array<i64: 1, 128>}, {transform_indices = @transform_11, window_bounds = array<i64: 16, 128>}]} {
    %c0_i32 = arith.constant 0 : i32
    %0 = arith.cmpi eq, %arg1, %c0_i32 : i32
    %1 = arith.extui %0 : i1 to i32
    %c0_i32_0 = arith.constant 0 : i32
    %2 = arith.cmpi ne, %1, %c0_i32_0 : i32
    scf.if %2 {
      %cst_9 = arith.constant 0.000000e+00 : f32
      %15 = vector.broadcast %cst_9 : f32 to vector<256x32xf32>
      %c0_10 = arith.constant 0 : index
      %c0_11 = arith.constant 0 : index
      %16 = vector.load %arg14[%c0_10, %c0_11] : memref<256x32xf32, #tpu.memory_space<vmem>>, vector<256x32xf32>
      tpu.vector_store %arg14[%c0_10, %c0_11], %15 {strides = array<i32>} : memref<256x32xf32, #tpu.memory_space<vmem>>, vector<256x32xf32>,
    } else {
    }
    %c256_i32 = arith.constant 256 : i32
    %3 = arith.muli %arg1, %c256_i32 : i32
    %4 = tpu.assume_multiple %3, 128 : i32
    %c0 = arith.constant 0 : index
    %c0_1 = arith.constant 0 : index
    %5 = vector.load %arg14[%c0, %c0_1] : memref<256x32xf32, #tpu.memory_space<vmem>>, vector<256x32xf32>
    %c0_2 = arith.constant 0 : index
    %c0_3 = arith.constant 0 : index
    %6 = vector.load %arg2[%c0_2, %c0_3] : memref<256x256xbf16, #tpu.memory_space<vmem>>, vector<256x256xbf16>
    %7 = arith.index_cast %4 : i32 to index
    %c0_4 = arith.constant 0 : index
    %8 = vector.load %arg3[%7, %c0_4] : memref<256x32xbf16, #tpu.memory_space<vmem>>, vector<256x32xbf16>
    %cst = arith.constant dense<0.000000e+00> : vector<256x32xf32>
    %9 = tpu.matmul %6, %8, %cst {dimension_numbers = #tpu.dot_dimension_numbers<[1], [0], [0], [1], [0, 0, 1, 1], [], []>} : vector<256x256xbf16>, vector<256x32xbf16>, vector<256x32xf32> -> vector<256x32xf32>
    %10 = arith.addf %5, %9 : vector<256x32xf32>
    %c0_5 = arith.constant 0 : index
    %c0_6 = arith.constant 0 : index
    %11 = vector.load %arg14[%c0_5, %c0_6] : memref<256x32xf32, #tpu.memory_space<vmem>>, vector<256x32xf32>
    tpu.vector_store %arg14[%c0_5, %c0_6], %10 {strides = array<i32>} : memref<256x32xf32, #tpu.memory_space<vmem>>, vector<256x32xf32>,
    %c0_i32_7 = arith.constant 0 : i32
    %12 = arith.cmpi eq, %arg1, %c0_i32_7 : i32
    %13 = arith.extui %12 : i1 to i32
    %c0_i32_8 = arith.constant 0 : i32
    %14 = arith.cmpi ne, %13, %c0_i32_8 : i32
    scf.if %14 {
      %c0_9 = arith.constant 0 : index
      %c0_10 = arith.constant 0 : index
      %15 = vector.load %arg14[%c0_9, %c0_10] : memref<256x32xf32, #tpu.memory_space<vmem>>, vector<256x32xf32>
      %c0_11 = arith.constant 0 : index
      %c0_12 = arith.constant 0 : index
      %16 = vector.load %arg4[%c0_11, %c0_12] : memref<1x32xf32, #tpu.memory_space<vmem>>, vector<1x32xf32>
      %17 = vector.broadcast %16 : vector<1x32xf32> to vector<256x32xf32>
      %18 = arith.addf %15, %17 : vector<256x32xf32>
      %cst_13 = arith.constant 0.000000e+00 : f32
      %19 = vector.broadcast %cst_13 : f32 to vector<256x32xf32>
      %20 = arith.maximumf %18, %19 : vector<256x32xf32>
      %21 = vector.shape_cast %20 : vector<256x32xf32> to vector<16x16x32xf32>
      %cst_14 = arith.constant dense<0xFF800000> : vector<16x32xf32>
      %22 = vector.multi_reduction <maximumf>, %21, %cst_14 [1] : vector<16x16x32xf32> to vector<16x32xf32>
      %c0_15 = arith.constant 0 : index
      %c0_16 = arith.constant 0 : index
      %23 = vector.load %arg5[%c0_15, %c0_16] : memref<16x5xf32, #tpu.memory_space<vmem>>, vector<16x5xf32>
      %c0_17 = arith.constant 0 : index
      %c0_18 = arith.constant 0 : index
      %24 = vector.load %arg6[%c0_17, %c0_18] : memref<5x32xf32, #tpu.memory_space<vmem>>, vector<5x32xf32>
      %cst_19 = arith.constant dense<0.000000e+00> : vector<16x32xf32>
      %25 = tpu.matmul %23, %24, %cst_19 {dimension_numbers = #tpu.dot_dimension_numbers<[1], [0], [0], [1], [0, 0, 1, 1], [], []>} : vector<16x5xf32>, vector<5x32xf32>, vector<16x32xf32> -> vector<16x32xf32>
      %c0_20 = arith.constant 0 : index
      %c0_21 = arith.constant 0 : index
      %26 = vector.load %arg7[%c0_20, %c0_21] : memref<1x32xf32, #tpu.memory_space<vmem>>, vector<1x32xf32>
      %27 = vector.broadcast %26 : vector<1x32xf32> to vector<16x32xf32>
      %28 = arith.addf %25, %27 : vector<16x32xf32>
      %cst_22 = arith.constant 0.000000e+00 : f32
      %29 = vector.broadcast %cst_22 : f32 to vector<16x32xf32>
      %30 = arith.maximumf %28, %29 : vector<16x32xf32>
      %c0_23 = arith.constant 0 : index
      %c0_24 = arith.constant 0 : index
      %31 = vector.load %arg8[%c0_23, %c0_24] : memref<32x32xf32, #tpu.memory_space<vmem>>, vector<32x32xf32>
      %cst_25 = arith.constant dense<0.000000e+00> : vector<16x32xf32>
      %32 = tpu.matmul %22, %31, %cst_25 {dimension_numbers = #tpu.dot_dimension_numbers<[1], [0], [0], [1], [0, 0, 1, 1], [], []>} : vector<16x32xf32>, vector<32x32xf32>, vector<16x32xf32> -> vector<16x32xf32>
      %c0_26 = arith.constant 0 : index
      %c0_27 = arith.constant 0 : index
      %33 = vector.load %arg9[%c0_26, %c0_27] : memref<32x32xf32, #tpu.memory_space<vmem>>, vector<32x32xf32>
      %cst_28 = arith.constant dense<0.000000e+00> : vector<16x32xf32>
      %34 = tpu.matmul %30, %33, %cst_28 {dimension_numbers = #tpu.dot_dimension_numbers<[1], [0], [0], [1], [0, 0, 1, 1], [], []>} : vector<16x32xf32>, vector<32x32xf32>, vector<16x32xf32> -> vector<16x32xf32>
      %35 = arith.addf %32, %34 : vector<16x32xf32>
      %c0_29 = arith.constant 0 : index
      %c0_30 = arith.constant 0 : index
      %36 = vector.load %arg10[%c0_29, %c0_30] : memref<1x32xf32, #tpu.memory_space<vmem>>, vector<1x32xf32>
      %37 = vector.broadcast %36 : vector<1x32xf32> to vector<16x32xf32>
      %38 = arith.addf %35, %37 : vector<16x32xf32>
      %cst_31 = arith.constant 0.000000e+00 : f32
      %39 = vector.broadcast %cst_31 : f32 to vector<16x32xf32>
      %40 = arith.maximumf %38, %39 : vector<16x32xf32>
      %c0_32 = arith.constant 0 : index
      %c0_33 = arith.constant 0 : index
      %41 = vector.load %arg11[%c0_32, %c0_33] : memref<32x128xf32, #tpu.memory_space<vmem>>, vector<32x128xf32>
      %cst_34 = arith.constant dense<0.000000e+00> : vector<16x128xf32>
      %42 = tpu.matmul %40, %41, %cst_34 {dimension_numbers = #tpu.dot_dimension_numbers<[1], [0], [0], [1], [0, 0, 1, 1], [], []>} : vector<16x32xf32>, vector<32x128xf32>, vector<16x128xf32> -> vector<16x128xf32>
      %c0_35 = arith.constant 0 : index
      %c0_36 = arith.constant 0 : index
      %43 = vector.load %arg12[%c0_35, %c0_36] : memref<1x128xf32, #tpu.memory_space<vmem>>, vector<1x128xf32>
      %44 = vector.broadcast %43 : vector<1x128xf32> to vector<16x128xf32>
      %45 = arith.addf %42, %44 : vector<16x128xf32>
      %cst_37 = arith.constant dense<0xFF800000> : vector<16xf32>
      %46 = vector.multi_reduction <maximumf>, %45, %cst_37 [1] : vector<16x128xf32> to vector<16xf32>
      %47 = vector.shape_cast %46 : vector<16xf32> to vector<16x1xf32>
      %48 = vector.broadcast %47 : vector<16x1xf32> to vector<16x128xf32>
      %49 = arith.subf %45, %48 : vector<16x128xf32>
      %50 = math.exp %49 : vector<16x128xf32>
      %cst_38 = arith.constant dense<0.000000e+00> : vector<16xf32>
      %51 = vector.multi_reduction <add>, %50, %cst_38 [1] : vector<16x128xf32> to vector<16xf32>
      %52 = vector.shape_cast %51 : vector<16xf32> to vector<16x1xf32>
      %53 = math.log %52 : vector<16x1xf32>
      %54 = vector.broadcast %53 : vector<16x1xf32> to vector<16x128xf32>
      %55 = arith.subf %49, %54 : vector<16x128xf32>
      %c0_39 = arith.constant 0 : index
      %c0_40 = arith.constant 0 : index
      %56 = vector.load %arg13[%c0_39, %c0_40] : memref<16x128xf32, #tpu.memory_space<vmem>>, vector<16x128xf32>
      tpu.vector_store %arg13[%c0_39, %c0_40], %55 {strides = array<i32>} : memref<16x128xf32, #tpu.memory_space<vmem>>, vector<16x128xf32>,
    } else {
    }
    return
  }
  func.func @transform_0(%arg0: i32, %arg1: i32) -> (i32, i32) {
    %c0_i32 = arith.constant 0 : i32
    return %arg0, %arg1 : i32, i32
  }
  func.func @transform_1(%arg0: i32, %arg1: i32) -> (i32, i32) {
    %c0_i32 = arith.constant 0 : i32
    %c0_i32_0 = arith.constant 0 : i32
    %c0_i32_1 = arith.constant 0 : i32
    return %c0_i32, %c0_i32_0 : i32, i32
  }
  func.func @transform_2(%arg0: i32, %arg1: i32) -> (i32, i32) {
    %c0_i32 = arith.constant 0 : i32
    %c0_i32_0 = arith.constant 0 : i32
    %c0_i32_1 = arith.constant 0 : i32
    return %c0_i32, %c0_i32_0 : i32, i32
  }
  func.func @transform_3(%arg0: i32, %arg1: i32) -> (i32, i32) {
    %c0_i32 = arith.constant 0 : i32
    %c0_i32_0 = arith.constant 0 : i32
    return %arg0, %c0_i32 : i32, i32
  }
  func.func @transform_4(%arg0: i32, %arg1: i32) -> (i32, i32) {
    %c0_i32 = arith.constant 0 : i32
    %c0_i32_0 = arith.constant 0 : i32
    %c0_i32_1 = arith.constant 0 : i32
    return %c0_i32, %c0_i32_0 : i32, i32
  }
  func.func @transform_5(%arg0: i32, %arg1: i32) -> (i32, i32) {
    %c0_i32 = arith.constant 0 : i32
    %c0_i32_0 = arith.constant 0 : i32
    %c0_i32_1 = arith.constant 0 : i32
    return %c0_i32, %c0_i32_0 : i32, i32
  }
  func.func @transform_6(%arg0: i32, %arg1: i32) -> (i32, i32) {
    %c0_i32 = arith.constant 0 : i32
    %c0_i32_0 = arith.constant 0 : i32
    %c0_i32_1 = arith.constant 0 : i32
    return %c0_i32, %c0_i32_0 : i32, i32
  }
  func.func @transform_7(%arg0: i32, %arg1: i32) -> (i32, i32) {
    %c0_i32 = arith.constant 0 : i32
    %c0_i32_0 = arith.constant 0 : i32
    %c0_i32_1 = arith.constant 0 : i32
    return %c0_i32, %c0_i32_0 : i32, i32
  }
  func.func @transform_8(%arg0: i32, %arg1: i32) -> (i32, i32) {
    %c0_i32 = arith.constant 0 : i32
    %c0_i32_0 = arith.constant 0 : i32
    %c0_i32_1 = arith.constant 0 : i32
    return %c0_i32, %c0_i32_0 : i32, i32
  }
  func.func @transform_9(%arg0: i32, %arg1: i32) -> (i32, i32) {
    %c0_i32 = arith.constant 0 : i32
    %c0_i32_0 = arith.constant 0 : i32
    %c0_i32_1 = arith.constant 0 : i32
    return %c0_i32, %c0_i32_0 : i32, i32
  }
  func.func @transform_10(%arg0: i32, %arg1: i32) -> (i32, i32) {
    %c0_i32 = arith.constant 0 : i32
    %c0_i32_0 = arith.constant 0 : i32
    %c0_i32_1 = arith.constant 0 : i32
    return %c0_i32, %c0_i32_0 : i32, i32
  }
  func.func @transform_11(%arg0: i32, %arg1: i32) -> (i32, i32) {
    %c0_i32 = arith.constant 0 : i32
    %c0_i32_0 = arith.constant 0 : i32
    return %arg0, %c0_i32 : i32, i32
  }
}

</mosaic_0001>

<bundles_post_ra>
// kernel: topo_model_forward.1
= control target key start
LH: loop header
LB: loop body
LE: loop exit
PB: predicated region body
PF: predicated region fallthrough
CT: control target
= control target key end

     0   :  { %vm936_vm0 = vcmask 1044480   ;;  %vm42_vm1 = vcmask 261120   ;;  %vm929_vm2 = vcmask 39936   ;;  %vm1018_vm3 = vcmask 1041409   ;;  %s1971_s1 = inlined_call_operand.vmem [shape: bf16[256,32], index: 1, kind: input, shape index: {}]   ;;  %s1972_s0 = inlined_call_operand.vmem [shape: bf16[256,256], index: 0, kind: input, shape index: {}]   ;;  %s1973_s4 = inlined_call_operand.vmem [shape: f32[5,32], index: 4, kind: input, shape index: {}]   ;;  %s1974_s2 = inlined_call_operand.vmem [shape: f32[1,32], index: 2, kind: input, shape index: {}]   ;;  %s1975_s3 = inlined_call_operand.vmem [shape: f32[16,5], index: 3, kind: input, shape index: {}]   ;;  %s1976_s5 = inlined_call_operand.vmem [shape: f32[1,32], index: 5, kind: input, shape index: {}]   ;;  %s1977_s7 = inlined_call_operand.vmem [shape: f32[32,32], index: 7, kind: input, shape index: {}]   ;;  %s1978_s6 = inlined_call_operand.vmem [shape: f32[32,32], index: 6, kind: input, shape index: {}]   ;;  %s1979_s8 = inlined_call_operand.vmem [shape: f32[1,32], index: 8, kind: input, shape index: {}]   ;;  %s1980_s10 = inlined_call_operand.vmem [shape: f32[1,128], index: 10, kind: input, shape index: {}]   ;;  %s1981_s9 = inlined_call_operand.vmem [shape: f32[32,128], index: 9, kind: input, shape index: {}]   ;;  %s1982_s11 = inlined_call_operand.vmem [shape: f32[16,128], index: 11, kind: output, shape index: {}]  }
   0x1   :  { %v1379_v0 = vld [vmem:[%s1971_s1 + $0x38] sm:$0xff]  ;;  %v1378_v2 = vld [vmem:[%s1971_s1 + $0x30] sm:$0xff]  ;;  %v1377_v4 = vld [vmem:[%s1971_s1 + $0x28] sm:$0xff]  ;;  %vm1020_vm4 = vcmask 1042434   ;;  %vm1022_vm5 = vcmask 1043459   ;;  %vm1024_vm6 = vcmask 1044484  }
   0x2   :  { %v1387_v1 = vld [vmem:[%s1971_s1 + $0x78] sm:$0xff]  ;;  %432 = vmatpush.bf16.msra.mxu0 %v1379_v0  ;;  %v1386_v3 = vld [vmem:[%s1971_s1 + $0x70] sm:$0xff]  ;;  %1388 = vmatpush.bf16.msra.mxu2 %v1379_v0  ;;  %v1385_v5 = vld [vmem:[%s1971_s1 + $0x68] sm:$0xff]  ;;  %vm1026_vm7 = vcmask 1045509   ;;  %vm1028_vm8 = vcmask 1046534   ;;  %vm1030_vm9 = vcmask 1047559  }
   0x3   :  { %521 = vmatpush.bf16.msra.mxu1 %v1387_v1  ;;  %1396 = vmatpush.bf16.msra.mxu3 %v1387_v1  ;;  %v1376_v6 = vld [vmem:[%s1971_s1 + $0x20] sm:$0xff]  ;;  %v1375_v8 = vld [vmem:[%s1971_s1 + $0x18] sm:$0xff]  ;;  %v1374_v10 = vld [vmem:[%s1971_s1 + $0x10] sm:$0xff] }
   0x4   :  { %v1384_v7 = vld [vmem:[%s1971_s1 + $0x60] sm:$0xff]  ;;  %v1383_v9 = vld [vmem:[%s1971_s1 + $0x58] sm:$0xff]  ;;  %v1382_v11 = vld [vmem:[%s1971_s1 + $0x50] sm:$0xff] }
   0x5   :  { %v1373_v12 = vld [vmem:[%s1971_s1 + $0x8] sm:$0xff]  ;;  %v1372_v14 = vld [vmem:[%s1971_s1] sm:$0xff]  ;;  %v1213_v20 = vld [vmem:[%s1972_s0 + $0x90] sm:$0xf] }
   0x6   :  { %433 = vmatpush.bf16.msra.mxu0 %v1378_v2  ;;  %1389 = vmatpush.bf16.msra.mxu2 %v1378_v2  ;;  %v1381_v13 = vld [vmem:[%s1971_s1 + $0x48] sm:$0xff]  ;;  %v1380_v15 = vld [vmem:[%s1971_s1 + $0x40] sm:$0xff]  ;;  %v1359_v21 = vld [vmem:[%s1972_s0 + $0x94] sm:$0xf0] }
   0x7   :  { %522 = vmatpush.bf16.msra.mxu1 %v1386_v3  ;;  %1397 = vmatpush.bf16.msra.mxu3 %v1386_v3  ;;  %v1141_v16 = vld [vmem:[%s1972_s0] sm:$0xf]  ;;  %v1341_v17 = vld [vmem:[%s1972_s0 + $0x4] sm:$0xf0]  ;;  %v1340_v18 = vld [vmem:[%s1972_s0 + $0x4] sm:$0xf]  ;;  %v1214_v26 = vor.u32 %v1359_v21, %v1213_v20 }
   0x8   :  { %v1143_v19 = vld [vmem:[%s1972_s0 + $0x8] sm:$0xf0]  ;;  %v1358_v22 = vld [vmem:[%s1972_s0 + $0x94] sm:$0xf]  ;;  %v1215_v23 = vld [vmem:[%s1972_s0 + $0x98] sm:$0xf0]  ;;  %v1142_v24 = vor.u32 %v1341_v17, %v1141_v16 }
   0x9   :  { %v1146_v25 = vor.u32 %v1340_v18, %v1143_v19  ;;  %v1218_v27 = vor.u32 %v1358_v22, %v1215_v23  ;;  %v924_v28 = vld [vmem:[%s1973_s4] sm:$0x1f]  ;;  %v1149_v29 = vld [vmem:[%s1972_s0 + $0x10] sm:$0xf]  ;;  %v1343_v30 = vld [vmem:[%s1972_s0 + $0x14] sm:$0xf0] }
   0xa   :  { %434 = vmatpush.bf16.msra.mxu0 %v1377_v4  ;;  %1390 = vmatpush.bf16.msra.mxu2 %v1377_v4  ;;  %v1342_v31 = vld [vmem:[%s1972_s0 + $0x14] sm:$0xf]  ;;  %v1151_v32 = vld [vmem:[%s1972_s0 + $0x18] sm:$0xf0]  ;;  %v1221_v33 = vld [vmem:[%s1972_s0 + $0xa0] sm:$0xf]  ;;  %v1150_v37 = vor.u32 %v1343_v30, %v1149_v29 }
   0xb   :  { %523 = vmatpush.bf16.msra.mxu1 %v1385_v5  ;;  %1398 = vmatpush.bf16.msra.mxu3 %v1385_v5  ;;  %v1361_v34 = vld [vmem:[%s1972_s0 + $0xa4] sm:$0xf0]  ;;  %v1360_v35 = vld [vmem:[%s1972_s0 + $0xa4] sm:$0xf]  ;;  %v1223_v36 = vld [vmem:[%s1972_s0 + $0xa8] sm:$0xf0]  ;;  %v1154_v38 = vor.u32 %v1342_v31, %v1151_v32 }
   0xc   :  { %v1222_v39 = vor.u32 %v1361_v34, %v1221_v33  ;;  %v1226_v40 = vor.u32 %v1360_v35, %v1223_v36  ;;  %v1157_v41 = vld [vmem:[%s1972_s0 + $0x20] sm:$0xf]  ;;  %v1345_v42 = vld [vmem:[%s1972_s0 + $0x24] sm:$0xf0]  ;;  %v1344_v43 = vld [vmem:[%s1972_s0 + $0x24] sm:$0xf] }
   0xd   :  { %v1159_v44 = vld [vmem:[%s1972_s0 + $0x28] sm:$0xf0]  ;;  %v1229_v45 = vld [vmem:[%s1972_s0 + $0xb0] sm:$0xf]  ;;  %v1363_v46 = vld [vmem:[%s1972_s0 + $0xb4] sm:$0xf0]  ;;  %v1158_v49 = vor.u32 %v1345_v42, %v1157_v41 }
   0xe   :  { %435 = vmatpush.bf16.msra.mxu0 %v1376_v6  ;;  %1391 = vmatpush.bf16.msra.mxu2 %v1376_v6  ;;  %v1362_v47 = vld [vmem:[%s1972_s0 + $0xb4] sm:$0xf]  ;;  %v1231_v48 = vld [vmem:[%s1972_s0 + $0xb8] sm:$0xf0]  ;;  %v1162_v50 = vor.u32 %v1344_v43, %v1159_v44  ;;  %v1230_v51 = vor.u32 %v1363_v46, %v1229_v45  ;;  %v1165_v53 = vld [vmem:[%s1972_s0 + $0x30] sm:$0xf] }
   0xf   :  { %524 = vmatpush.bf16.msra.mxu1 %v1384_v7  ;;  %1399 = vmatpush.bf16.msra.mxu3 %v1384_v7  ;;  %v1234_v52 = vor.u32 %v1362_v47, %v1231_v48  ;;  %v1347_v54 = vld [vmem:[%s1972_s0 + $0x34] sm:$0xf0]  ;;  %v1346_v55 = vld [vmem:[%s1972_s0 + $0x34] sm:$0xf]  ;;  %v1167_v56 = vld [vmem:[%s1972_s0 + $0x38] sm:$0xf0] }
  0x10   :  { %v1237_v57 = vld [vmem:[%s1972_s0 + $0xc0] sm:$0xf]  ;;  %v1365_v58 = vld [vmem:[%s1972_s0 + $0xc4] sm:$0xf0]  ;;  %v1364_v59 = vld [vmem:[%s1972_s0 + $0xc4] sm:$0xf]  ;;  %v1166_v61 = vor.u32 %v1347_v54, %v1165_v53  ;;  %v1170_v62 = vor.u32 %v1346_v55, %v1167_v56 }
  0x11   :  { %v1239_v60 = vld [vmem:[%s1972_s0 + $0xc8] sm:$0xf0]  ;;  %v1238_v63 = vor.u32 %v1365_v58, %v1237_v57  ;;  %v1173_v1 = vld [vmem:[%s1972_s0 + $0x40] sm:$0xf]  ;;  %v1349_v2 = vld [vmem:[%s1972_s0 + $0x44] sm:$0xf0] }
  0x12   :  { %436 = vmatpush.bf16.msra.mxu0 %v1375_v8  ;;  %1392 = vmatpush.bf16.msra.mxu2 %v1375_v8  ;;  %v1242_v0 = vor.u32 %v1364_v59, %v1239_v60  ;;  %v1348_v3 = vld [vmem:[%s1972_s0 + $0x44] sm:$0xf]  ;;  %v1175_v4 = vld [vmem:[%s1972_s0 + $0x48] sm:$0xf0]  ;;  %v1245_v5 = vld [vmem:[%s1972_s0 + $0xd0] sm:$0xf] }
  0x13   :  { %525 = vmatpush.bf16.msra.mxu1 %v1383_v9  ;;  %1400 = vmatpush.bf16.msra.mxu3 %v1383_v9  ;;  %v1367_v6 = vld [vmem:[%s1972_s0 + $0xd4] sm:$0xf0]  ;;  %v1366_v7 = vld [vmem:[%s1972_s0 + $0xd4] sm:$0xf]  ;;  %v1247_v8 = vld [vmem:[%s1972_s0 + $0xd8] sm:$0xf0]  ;;  %v1174_v9 = vor.u32 %v1349_v2, %v1173_v1 }
  0x14   :  { %v1183_v16 = vld [vmem:[%s1972_s0 + $0x58] sm:$0xf0]  ;;  %v1253_v17 = vld [vmem:[%s1972_s0 + $0xe0] sm:$0xf]  ;;  %v1369_v18 = vld [vmem:[%s1972_s0 + $0xe4] sm:$0xf0] }
  0x15   :  { %v1368_v19 = vld [vmem:[%s1972_s0 + $0xe4] sm:$0xf]  ;;  %v1255_v20 = vld [vmem:[%s1972_s0 + $0xe8] sm:$0xf0]  ;;  %v1254_v23 = vor.u32 %v1369_v18, %v1253_v17  ;;  %v1417_v29 = vmov 0.0  }
  0x16   :  { %437 = vmatpush.bf16.msra.mxu0 %v1374_v10  ;;  %1393 = vmatpush.bf16.msra.mxu2 %v1374_v10  ;;  %v1178_v10 = vor.u32 %v1348_v3, %v1175_v4  ;;  %43 = vst.msk [vmem:[#allocation2] sm:$0xff] %vm42_vm1, %v1417_v29  ;;  %v1261_v30 = vld [vmem:[%s1972_s0 + $0xf0] sm:$0xf]  ;;  %v1371_v31 = vld [vmem:[%s1972_s0 + $0xf4] sm:$0xf0]  ;;  %v922_v44 = vld [vmem:[%s1975_s3] sm:$0xff] }
  0x17   :  { %526 = vmatpush.bf16.msra.mxu1 %v1382_v11  ;;  %1401 = vmatpush.bf16.msra.mxu3 %v1382_v11  ;;  %v1246_v11 = vor.u32 %v1367_v6, %v1245_v5  ;;  %44 = vst.msk [vmem:[#allocation2 + $0x8] sm:$0xff] %vm42_vm1, %v1417_v29  ;;  %v1370_v32 = vld [vmem:[%s1972_s0 + $0xf4] sm:$0xf]  ;;  %v1263_v33 = vld [vmem:[%s1972_s0 + $0xf8] sm:$0xf0]  ;;  %v1262_v36 = vor.u32 %v1371_v31, %v1261_v30  ;;  %v923_v56 = vld [vmem:[%s1975_s3 + $0x8] sm:$0xff] }
  0x18   :  { %45 = vst.msk [vmem:[#allocation2 + $0x10] sm:$0xff] %vm42_vm1, %v1417_v29  ;;  %v1199_v41 = vld [vmem:[%s1972_s0 + $0x78] sm:$0xf0]  ;;  %v1205_v45 = vld [vmem:[%s1972_s0 + $0x80] sm:$0xf] }
  0x19   :  { %46 = vst.msk [vmem:[#allocation2 + $0x18] sm:$0xff] %vm42_vm1, %v1417_v29  ;;  %v1357_v46 = vld [vmem:[%s1972_s0 + $0x84] sm:$0xf0]  ;;  %v1356_v47 = vld [vmem:[%s1972_s0 + $0x84] sm:$0xf] }
  0x1a   :  { %438 = vmatpush.bf16.msra.mxu0 %v1373_v12  ;;  %1394 = vmatpush.bf16.msra.mxu2 %v1373_v12  ;;  %v1250_v12 = vor.u32 %v1366_v7, %v1247_v8  ;;  %47 = vst.msk [vmem:[#allocation2 + $0x20] sm:$0xff] %vm42_vm1, %v1417_v29  ;;  %v1207_v48 = vld [vmem:[%s1972_s0 + $0x88] sm:$0xf0] }
  0x1b   :  { %527 = vmatpush.bf16.msra.mxu1 %v1381_v13  ;;  %1402 = vmatpush.bf16.msra.mxu3 %v1381_v13  ;;  %v1181_v13 = vld [vmem:[%s1972_s0 + $0x50] sm:$0xf]  ;;  %48 = vst.msk [vmem:[#allocation2 + $0x28] sm:$0xff] %vm42_vm1, %v1417_v29 }
  0x1c   :  { %49 = vst.msk [vmem:[#allocation2 + $0x30] sm:$0xff] %vm42_vm1, %v1417_v29 }
  0x1d   :  { %50 = vst.msk [vmem:[#allocation2 + $0x38] sm:$0xff] %vm42_vm1, %v1417_v29 }
  0x1e   :  { %439 = vmatpush.bf16.msra.mxu0 %v1372_v14  ;;  %1395 = vmatpush.bf16.msra.mxu2 %v1372_v14  ;;  %v1351_v14 = vld [vmem:[%s1972_s0 + $0x54] sm:$0xf0]  ;;  %51 = vst.msk [vmem:[#allocation2 + $0x40] sm:$0xff] %vm42_vm1, %v1417_v29 }
  0x1f   :  { %528 = vmatpush.bf16.msra.mxu1 %v1380_v15  ;;  %1403 = vmatpush.bf16.msra.mxu3 %v1380_v15  ;;  %v1350_v15 = vld [vmem:[%s1972_s0 + $0x54] sm:$0xf]  ;;  %v1182_v21 = vor.u32 %v1351_v14, %v1181_v13  ;;  %52 = vst.msk [vmem:[#allocation2 + $0x48] sm:$0xff] %vm42_vm1, %v1417_v29  ;;  %v972_v13 = vld [vmem:[%s1977_s7 + $0x18] sm:$0xff] }
  0x20   :  { %v1186_v22 = vor.u32 %v1350_v15, %v1183_v16  ;;  %53 = vst.msk [vmem:[#allocation2 + $0x50] sm:$0xff] %vm42_vm1, %v1417_v29  ;;  %v78_v7 = vld [vmem:[#allocation2 + $0x10] sm:$0xff]  ;;  %v79_v18 = vld [vmem:[#allocation2 + $0x18] sm:$0xff] }
  0x21   :  { %440 = vmatmul.bf16.vlgmr.msra.gmra.mxu0 %v1142_v24  ;;  %485 = vmatmul.bf16.vlgmr.msra.gmra.mxu2 %v1214_v26  ;;  %v1258_v24 = vor.u32 %v1368_v19, %v1255_v20  ;;  %v1353_v26 = vld [vmem:[%s1972_s0 + $0x64] sm:$0xf0]  ;;  %54 = vst.msk [vmem:[#allocation2 + $0x58] sm:$0xff] %vm42_vm1, %v1417_v29 }
  0x22   :  { %529 = vmatmul.bf16.vlgmr.msra.gmra.mxu1 %v1146_v25  ;;  %574 = vmatmul.bf16.vlgmr.msra.gmra.mxu3 %v1218_v27  ;;  %v1189_v25 = vld [vmem:[%s1972_s0 + $0x60] sm:$0xf]  ;;  %v1352_v27 = vld [vmem:[%s1972_s0 + $0x64] sm:$0xf]  ;;  %55 = vst.msk [vmem:[#allocation2 + $0x60] sm:$0xff] %vm42_vm1, %v1417_v29 }
  0x23   :  { %1331 = vmatpush.msk.msrb.mxu2 %vm936_vm0, %v924_v28  ;;  %v1191_v28 = vld [vmem:[%s1972_s0 + $0x68] sm:$0xf0]  ;;  %v1190_v34 = vor.u32 %v1353_v26, %v1189_v25  ;;  %56 = vst.msk [vmem:[#allocation2 + $0x68] sm:$0xff] %vm42_vm1, %v1417_v29  ;;  %991 = vmatpush.msrb.mxu3 %v972_v13 }
  0x24   :  { %v1194_v35 = vor.u32 %v1352_v27, %v1191_v28  ;;  %57 = vst.msk [vmem:[#allocation2 + $0x70] sm:$0xff] %vm42_vm1, %v1417_v29  ;;  %v80_v28 = vld [vmem:[#allocation2 + $0x20] sm:$0xff] }
  0x25   :  { %58 = vst.msk [vmem:[#allocation2 + $0x78] sm:$0xff] %vm42_vm1, %v1417_v29 }
  0x26   :  { %59 = vst.msk [vmem:[#allocation2 + $0x80] sm:$0xff] %vm42_vm1, %v1417_v29 }
  0x27   :  { %60 = vst.msk [vmem:[#allocation2 + $0x88] sm:$0xff] %vm42_vm1, %v1417_v29 }
  0x28   :  { %61 = vst.msk [vmem:[#allocation2 + $0x90] sm:$0xff] %vm42_vm1, %v1417_v29 }
  0x29   :  { %62 = vst.msk [vmem:[#allocation2 + $0x98] sm:$0xff] %vm42_vm1, %v1417_v29 }
  0x2a   :  { %63 = vst.msk [vmem:[#allocation2 + $0xa0] sm:$0xff] %vm42_vm1, %v1417_v29 }
  0x2b   :  { %64 = vst.msk [vmem:[#allocation2 + $0xa8] sm:$0xff] %vm42_vm1, %v1417_v29 }
  0x2c   :  { %65 = vst.msk [vmem:[#allocation2 + $0xb0] sm:$0xff] %vm42_vm1, %v1417_v29 }
  0x2d   :  { %66 = vst.msk [vmem:[#allocation2 + $0xb8] sm:$0xff] %vm42_vm1, %v1417_v29 }
  0x2e   :  { %67 = vst.msk [vmem:[#allocation2 + $0xc0] sm:$0xff] %vm42_vm1, %v1417_v29 }
  0x2f   :  { %68 = vst.msk [vmem:[#allocation2 + $0xc8] sm:$0xff] %vm42_vm1, %v1417_v29  ;;  %v94_v58 = vld [vmem:[#allocation2 + $0x90] sm:$0xff] }
  0x30   :  { %69 = vst.msk [vmem:[#allocation2 + $0xd0] sm:$0xff] %vm42_vm1, %v1417_v29  ;;  %v95_v4 = vld [vmem:[#allocation2 + $0x98] sm:$0xff] }
  0x31   :  { %445 = vmatmul.bf16.gmra.mxu0 %v1150_v37  ;;  %490 = vmatmul.bf16.gmra.mxu2 %v1222_v39  ;;  %v1266_v37 = vor.u32 %v1370_v32, %v1263_v33  ;;  %v1355_v39 = vld [vmem:[%s1972_s0 + $0x74] sm:$0xf0]  ;;  %70 = vst.msk [vmem:[#allocation2 + $0xd8] sm:$0xff] %vm42_vm1, %v1417_v29  ;;  %v96_v15 = vld [vmem:[#allocation2 + $0xa0] sm:$0xff] }
  0x32   :  { %534 = vmatmul.bf16.gmra.mxu1 %v1154_v38  ;;  %579 = vmatmul.bf16.gmra.mxu3 %v1226_v40  ;;  %v1197_v38 = vld [vmem:[%s1972_s0 + $0x70] sm:$0xf]  ;;  %v1354_v40 = vld [vmem:[%s1972_s0 + $0x74] sm:$0xf]  ;;  %71 = vst.msk [vmem:[#allocation2 + $0xe0] sm:$0xff] %vm42_vm1, %v1417_v29  ;;  %v97_v25 = vld [vmem:[#allocation2 + $0xa8] sm:$0xff] }
  0x33   :  { %v1198_v42 = vor.u32 %v1355_v39, %v1197_v38  ;;  %v1202_v43 = vor.u32 %v1354_v40, %v1199_v41  ;;  %72 = vst.msk [vmem:[#allocation2 + $0xe8] sm:$0xff] %vm42_vm1, %v1417_v29  ;;  %v81_v38 = vld [vmem:[#allocation2 + $0x28] sm:$0xff] }
  0x34   :  { %73 = vst.msk [vmem:[#allocation2 + $0xf0] sm:$0xff] %vm42_vm1, %v1417_v29 }
  0x35   :  { %74 = vst.msk [vmem:[#allocation2 + $0xf8] sm:$0xff] %vm42_vm1, %v1417_v29 }
  0x41   :  { %450 = vmatmul.bf16.gmra.mxu0 %v1158_v49  ;;  %495 = vmatmul.bf16.gmra.mxu2 %v1230_v51  ;;  %v1206_v49 = vor.u32 %v1357_v46, %v1205_v45  ;;  %v99_v45 = vld [vmem:[#allocation2 + $0xb8] sm:$0xff] }
  0x42   :  { %539 = vmatmul.bf16.gmra.mxu1 %v1162_v50  ;;  %584 = vmatmul.bf16.gmra.mxu3 %v1234_v52  ;;  %v1210_v50 = vor.u32 %v1356_v47, %v1207_v48  ;;  %v76_v52 = vld [vmem:[#allocation2] sm:$0xff]  ;;  %v82_v48 = vld [vmem:[#allocation2 + $0x30] sm:$0xff] }
  0x51   :  { %455 = vmatmul.bf16.gmra.mxu0 %v1166_v61  ;;  %500 = vmatmul.bf16.gmra.mxu2 %v1238_v63  ;;  %v77_v61 = vld [vmem:[#allocation2 + $0x8] sm:$0xff] }
  0x52   :  { %544 = vmatmul.bf16.gmra.mxu1 %v1170_v62  ;;  %589 = vmatmul.bf16.gmra.mxu3 %v1242_v0 }
  0x61   :  { %460 = vmatmul.bf16.gmra.mxu0 %v1174_v9  ;;  %505 = vmatmul.bf16.gmra.mxu2 %v1246_v11 }
  0x62   :  { %549 = vmatmul.bf16.gmra.mxu1 %v1178_v10  ;;  %594 = vmatmul.bf16.gmra.mxu3 %v1250_v12 }
  0x71   :  { %465 = vmatmul.bf16.gmra.mxu0 %v1182_v21  ;;  %510 = vmatmul.bf16.gmra.mxu2 %v1254_v23 }
  0x72   :  { %554 = vmatmul.bf16.gmra.mxu1 %v1186_v22  ;;  %599 = vmatmul.bf16.gmra.mxu3 %v1258_v24 }
  0x81   :  { %470 = vmatmul.bf16.gmra.mxu0 %v1190_v34  ;;  %515 = vmatmul.bf16.gmra.mxu2 %v1262_v36 }
  0x82   :  { %559 = vmatmul.bf16.gmra.mxu1 %v1194_v35  ;;  %604 = vmatmul.bf16.gmra.mxu3 %v1266_v37  ;;  %v98_v35 = vld [vmem:[#allocation2 + $0xb0] sm:$0xff] }
  0x91   :  { %475 = vmatmul.bf16.gmra.mxu0 %v1198_v42  ;;  %1332 = vmatmul.msk.f32.vlgmr.msrb.gmra.mxu2 %vm929_vm2, %v922_v44 }
  0x92   :  { %564 = vmatmul.bf16.gmra.mxu1 %v1202_v43 }
  0x99   :  { %1333 = vmatmul.msk.f32.gmra.mxu2 %vm929_vm2, %v923_v56  ;;  %v100_v56 = vld [vmem:[#allocation2 + $0xc0] sm:$0xff] }
  0x9e   :  { %v441_v51 = vpop.f32.mrf.mxu0 }
  0x9f   :  { %v530_v53 = vpop.f32.mrf.mxu1 }
  0xa0   :  { %v531_v54 = vadd.f32 %v530_v53, %v441_v51 }
  0xa1   :  { %480 = vmatmul.bf16.gmra.mxu0 %v1206_v49 }
  0xa2   :  { %v610_v55 = vadd.f32 %v531_v54, %v76_v52  ;;  %569 = vmatmul.bf16.gmra.mxu1 %v1210_v50  ;;  %v971_v54 = vld [vmem:[%s1977_s7 + $0x10] sm:$0xff] }
  0xa3   :  { %992 = vmatpush.msrb.mxu3 %v971_v54 }
  0xa4   :  { %643 = vst.msk [vmem:[#allocation2] sm:$0xff] %vm42_vm1, %v610_v55  ;;  %v486_v57 = vpop.f32.mrf.mxu2 }
  0xa5   :  { %v575_v59 = vpop.f32.mrf.mxu3 }
  0xa6   :  { %v443_v60 = vpop.f32.mrf.mxu0  ;;  %v576_v63 = vadd.f32 %v575_v59, %v486_v57  ;;  %v83_v59 = vld [vmem:[#allocation2 + $0x38] sm:$0xff] }
  0xa7   :  { %v532_v62 = vpop.f32.mrf.mxu1 }
  0xa8   :  { %v533_v0 = vadd.f32 %v532_v62, %v443_v60  ;;  %v628_v1 = vadd.f32 %v576_v63, %v94_v58 }
  0xaa   :  { %v611_v2 = vadd.f32 %v533_v0, %v77_v61  ;;  %661 = vst.msk [vmem:[#allocation2 + $0x90] sm:$0xff] %vm42_vm1, %v628_v1 }
  0xac   :  { %644 = vst.msk [vmem:[#allocation2 + $0x8] sm:$0xff] %vm42_vm1, %v611_v2  ;;  %v488_v3 = vpop.f32.mrf.mxu2  ;;  %v101_v2 = vld [vmem:[#allocation2 + $0xc8] sm:$0xff] }
  0xad   :  { %v577_v5 = vpop.f32.mrf.mxu3 }
  0xae   :  { %v446_v6 = vpop.f32.mrf.mxu0  ;;  %v578_v9 = vadd.f32 %v577_v5, %v488_v3  ;;  %v84_v5 = vld [vmem:[#allocation2 + $0x40] sm:$0xff] }
  0xaf   :  { %v535_v8 = vpop.f32.mrf.mxu1 }
  0xb0   :  { %v536_v10 = vadd.f32 %v535_v8, %v446_v6  ;;  %v629_v11 = vadd.f32 %v578_v9, %v95_v4 }
  0xb2   :  { %v612_v12 = vadd.f32 %v536_v10, %v78_v7  ;;  %662 = vst.msk [vmem:[#allocation2 + $0x98] sm:$0xff] %vm42_vm1, %v629_v11 }
  0xb4   :  { %645 = vst.msk [vmem:[#allocation2 + $0x10] sm:$0xff] %vm42_vm1, %v612_v12  ;;  %v491_v14 = vpop.f32.mrf.mxu2  ;;  %v102_v12 = vld [vmem:[#allocation2 + $0xd0] sm:$0xff] }
  0xb5   :  { %v580_v16 = vpop.f32.mrf.mxu3 }
  0xb6   :  { %v448_v17 = vpop.f32.mrf.mxu0  ;;  %v581_v20 = vadd.f32 %v580_v16, %v491_v14 }
  0xb7   :  { %v537_v19 = vpop.f32.mrf.mxu1 }
  0xb8   :  { %v538_v21 = vadd.f32 %v537_v19, %v448_v17  ;;  %v630_v22 = vadd.f32 %v581_v20, %v96_v15  ;;  %v85_v15 = vld [vmem:[#allocation2 + $0x48] sm:$0xff] }
  0xba   :  { %v613_v23 = vadd.f32 %v538_v21, %v79_v18  ;;  %663 = vst.msk [vmem:[#allocation2 + $0xa0] sm:$0xff] %vm42_vm1, %v630_v22  ;;  %v970_v21 = vld [vmem:[%s1977_s7 + $0x8] sm:$0xff] }
  0xbb   :  { %993 = vmatpush.msrb.mxu3 %v970_v21 }
  0xbc   :  { %646 = vst.msk [vmem:[#allocation2 + $0x18] sm:$0xff] %vm42_vm1, %v613_v23  ;;  %v493_v24 = vpop.f32.mrf.mxu2  ;;  %v103_v23 = vld [vmem:[#allocation2 + $0xd8] sm:$0xff] }
  0xbd   :  { %v582_v26 = vpop.f32.mrf.mxu3 }
  0xbe   :  { %v451_v27 = vpop.f32.mrf.mxu0  ;;  %v583_v30 = vadd.f32 %v582_v26, %v493_v24  ;;  %v86_v26 = vld [vmem:[#allocation2 + $0x50] sm:$0xff] }
  0xbf   :  { %v540_v29 = vpop.f32.mrf.mxu1 }
  0xc0   :  { %v541_v31 = vadd.f32 %v540_v29, %v451_v27  ;;  %v631_v32 = vadd.f32 %v583_v30, %v97_v25 }
  0xc2   :  { %v614_v33 = vadd.f32 %v541_v31, %v80_v28  ;;  %664 = vst.msk [vmem:[#allocation2 + $0xa8] sm:$0xff] %vm42_vm1, %v631_v32  ;;  %v679_v32 = vld [vmem:[#allocation2 + $0x8] sm:$0xff] }
  0xc4   :  { %647 = vst.msk [vmem:[#allocation2 + $0x20] sm:$0xff] %vm42_vm1, %v614_v33  ;;  %v496_v34 = vpop.f32.mrf.mxu2 }
  0xc5   :  { %v585_v36 = vpop.f32.mrf.mxu3 }
  0xc6   :  { %v453_v37 = vpop.f32.mrf.mxu0  ;;  %v586_v40 = vadd.f32 %v585_v36, %v496_v34  ;;  %v104_v34 = vld [vmem:[#allocation2 + $0xe0] sm:$0xff] }
  0xc7   :  { %v542_v39 = vpop.f32.mrf.mxu1  ;;  %v1794_v36 = vld [vmem:[%s1974_s2] ss:$0 sm:$0xff] }
  0xc8   :  { %v543_v41 = vadd.f32 %v542_v39, %v453_v37  ;;  %v632_v42 = vadd.f32 %v586_v40, %v98_v35 }
  0xca   :  { %v615_v43 = vadd.f32 %v543_v41, %v81_v38  ;;  %665 = vst.msk [vmem:[#allocation2 + $0xb0] sm:$0xff] %vm42_vm1, %v632_v42  ;;  %v87_v38 = vld [vmem:[#allocation2 + $0x58] sm:$0xff]  ;;  %v678_v41 = vld [vmem:[#allocation2] sm:$0xff] }
  0xcb   :  { %v681_v42 = vld [vmem:[#allocation2 + $0x18] sm:$0xff] }
  0xcc   :  { %648 = vst.msk [vmem:[#allocation2 + $0x28] sm:$0xff] %vm42_vm1, %v615_v43  ;;  %v498_v44 = vpop.f32.mrf.mxu2 }
  0xcd   :  { %v587_v46 = vpop.f32.mrf.mxu3 }
  0xce   :  { %v456_v47 = vpop.f32.mrf.mxu0  ;;  %v588_v50 = vadd.f32 %v587_v46, %v498_v44  ;;  %v715_v44 = vadd.f32 %v1794_v36, %v679_v32  ;;  %v680_v46 = vld [vmem:[#allocation2 + $0x10] sm:$0xff] }
  0xcf   :  { %v545_v49 = vpop.f32.mrf.mxu1 }
  0xd0   :  { %v546_v51 = vadd.f32 %v545_v49, %v456_v47  ;;  %v633_v52 = vadd.f32 %v588_v50, %v99_v45  ;;  %v717_v49 = vadd.f32 %v1794_v36, %v681_v42  ;;  %v716_v50 = vadd.f32 %v1794_v36, %v680_v46  ;;  %v967_v42 = vld [vmem:[%s1978_s6 + $0x10] sm:$0xff] }
  0xd2   :  { %v616_v53 = vadd.f32 %v546_v51, %v82_v48  ;;  %666 = vst.msk [vmem:[#allocation2 + $0xb8] sm:$0xff] %vm42_vm1, %v633_v52  ;;  %v714_v48 = vadd.f32 %v1794_v36, %v678_v41  ;;  %v747_v51 = vmax.f32 %v715_v44, 0.0  ;;  %v698_v41 = vld [vmem:[#allocation2 + $0xa0] sm:$0xff] }
  0xd4   :  { %649 = vst.msk [vmem:[#allocation2 + $0x30] sm:$0xff] %vm42_vm1, %v616_v53  ;;  %v501_v55 = vpop.f32.mrf.mxu2  ;;  %v105_v53 = vld [vmem:[#allocation2 + $0xe8] sm:$0xff] }
  0xd5   :  { %v590_v57 = vpop.f32.mrf.mxu3 }
  0xd6   :  { %v458_v58 = vpop.f32.mrf.mxu0  ;;  %v591_v61 = vadd.f32 %v590_v57, %v501_v55  ;;  %v746_v55 = vmax.f32 %v714_v48, 0.0 }
  0xd7   :  { %v547_v60 = vpop.f32.mrf.mxu1 }
  0xd8   :  { %v548_v62 = vadd.f32 %v547_v60, %v458_v58  ;;  %v634_v63 = vadd.f32 %v591_v61, %v100_v56  ;;  %v749_v56 = vmax.f32 %v717_v49, 0.0  ;;  %v88_v58 = vld [vmem:[#allocation2 + $0x60] sm:$0xff]  ;;  %v107_v49 = vld [vmem:[#allocation2 + $0xf8] sm:$0xff] }
  0xda   :  { %v617_v0 = vadd.f32 %v548_v62, %v83_v59  ;;  %667 = vst.msk [vmem:[#allocation2 + $0xc0] sm:$0xff] %vm42_vm1, %v634_v63  ;;  %v748_v62 = vmax.f32 %v716_v50, 0.0  ;;  %v779_v63 = vsel %vm42_vm1, %v747_v51, -inf  ;;  %v966_v51 = vld [vmem:[%s1978_s6 + $0x8] sm:$0xff] }
  0xdc   :  { %650 = vst.msk [vmem:[#allocation2 + $0x38] sm:$0xff] %vm42_vm1, %v617_v0  ;;  %v503_v1 = vpop.f32.mrf.mxu2 }
  0xdd   :  { %v592_v3 = vpop.f32.mrf.mxu3 }
  0xde   :  { %v461_v4 = vpop.f32.mrf.mxu0  ;;  %v593_v7 = vadd.f32 %v592_v3, %v503_v1  ;;  %v683_v1 = vld [vmem:[#allocation2 + $0x28] sm:$0xff]  ;;  %v778_v3 = vsel %vm42_vm1, %v746_v55, -inf }
  0xdf   :  { %v550_v6 = vpop.f32.mrf.mxu1 }
  0xe0   :  { %v551_v8 = vadd.f32 %v550_v6, %v461_v4  ;;  %v635_v9 = vadd.f32 %v593_v7, %v101_v2  ;;  %v788_v4 = vsel %vm42_vm1, %v749_v56, -inf  ;;  %v780_v6 = vmax.f32 %v778_v3, %v779_v63 }
  0xe1   :  { %v719_v7 = vadd.f32 %v1794_v36, %v683_v1  ;;  %v1839_v63 = vadd.f32 %v1794_v36, %v698_v41  ;;  %v965_v1 = vld [vmem:[%s1978_s6] sm:$0xff] }
  0xe2   :  { %v618_v10 = vadd.f32 %v551_v8, %v84_v5  ;;  %668 = vst.msk [vmem:[#allocation2 + $0xc8] sm:$0xff] %vm42_vm1, %v635_v9  ;;  %v682_v5 = vld [vmem:[#allocation2 + $0x20] sm:$0xff]  ;;  %v787_v8 = vsel %vm42_vm1, %v748_v62, -inf }
  0xe3   :  { %v789_v9 = vmax.f32 %v787_v8, %v788_v4 }
  0xe4   :  { %651 = vst.msk [vmem:[#allocation2 + $0x40] sm:$0xff] %vm42_vm1, %v618_v10  ;;  %v506_v11 = vpop.f32.mrf.mxu2 }
  0xe5   :  { %v595_v13 = vpop.f32.mrf.mxu3 }
  0xe6   :  { %v463_v14 = vpop.f32.mrf.mxu0  ;;  %v596_v17 = vadd.f32 %v595_v13, %v506_v11  ;;  %v106_v11 = vld [vmem:[#allocation2 + $0xf0] sm:$0xff]  ;;  %v718_v13 = vadd.f32 %v1794_v36, %v682_v5 }
  0xe7   :  { %v552_v16 = vpop.f32.mrf.mxu1 }
  0xe8   :  { %v553_v18 = vadd.f32 %v552_v16, %v463_v14  ;;  %v636_v19 = vadd.f32 %v596_v17, %v102_v12  ;;  %v696_v14 = vld [vmem:[#allocation2 + $0x90] sm:$0xff]  ;;  %v89_v16 = vld [vmem:[#allocation2 + $0x68] sm:$0xff] }
  0xea   :  { %v619_v20 = vadd.f32 %v553_v18, %v85_v15  ;;  %669 = vst.msk [vmem:[#allocation2 + $0xd0] sm:$0xff] %vm42_vm1, %v636_v19  ;;  %v685_v19 = vld [vmem:[#allocation2 + $0x38] sm:$0xff] }
  0xeb   :  { %v686_v32 = vld [vmem:[#allocation2 + $0x40] sm:$0xff] }
  0xec   :  { %652 = vst.msk [vmem:[#allocation2 + $0x48] sm:$0xff] %vm42_vm1, %v619_v20  ;;  %v508_v22 = vpop.f32.mrf.mxu2  ;;  %v781_v20 = vrot.slane %v780_v6, 4 }
  0xed   :  { %v597_v24 = vpop.f32.mrf.mxu3 }
  0xee   :  { %v466_v25 = vpop.f32.mrf.mxu0  ;;  %v598_v28 = vadd.f32 %v597_v24, %v508_v22  ;;  %v751_v22 = vmax.f32 %v719_v7, 0.0  ;;  %v684_v24 = vld [vmem:[#allocation2 + $0x30] sm:$0xff] }
  0xef   :  { %v555_v27 = vpop.f32.mrf.mxu1 }
  0xf0   :  { %v556_v29 = vadd.f32 %v555_v27, %v466_v25  ;;  %v637_v30 = vadd.f32 %v598_v28, %v103_v23  ;;  %v1811_v27 = vadd.f32 %v1794_v36, %v696_v14 }
  0xf2   :  { %v620_v31 = vadd.f32 %v556_v29, %v86_v26  ;;  %670 = vst.msk [vmem:[#allocation2 + $0xd8] sm:$0xff] %vm42_vm1, %v637_v30  ;;  %v790_v26 = vrot.slane %v789_v9, 4  ;;  %v721_v29 = vadd.f32 %v1794_v36, %v685_v19  ;;  %v750_v30 = vmax.f32 %v718_v13, 0.0  ;;  %v1852_v13 = vld [vmem:[%s1976_s5] ss:$0 sm:$0xff] }
  0xf3   :  { %v687_v25 = vld [vmem:[#allocation2 + $0x48] sm:$0xff] }
  0xf4   :  { %653 = vst.msk [vmem:[#allocation2 + $0x50] sm:$0xff] %vm42_vm1, %v620_v31  ;;  %v511_v33 = vpop.f32.mrf.mxu2  ;;  %v697_v31 = vld [vmem:[#allocation2 + $0x98] sm:$0xff]  ;;  %v791_v44 = vmax.f32 %v789_v9, %v790_v26  ;;  %v753_v55 = vmax.f32 %v721_v29, 0.0  ;;  %v796_v56 = vsel %vm42_vm1, %v750_v30, -inf  ;;  %v766_v26 = vmax.f32 %v1839_v63, 0.0 }
  0xf5   :  { %v600_v35 = vpop.f32.mrf.mxu3  ;;  %v1829_v46 = vadd.f32 %v1794_v36, %v697_v31 }
  0xf6   :  { %v468_v37 = vpop.f32.mrf.mxu0  ;;  %v601_v40 = vadd.f32 %v600_v35, %v511_v33  ;;  %v969_v35 = vld [vmem:[%s1977_s7] sm:$0xff]  ;;  %v792_v7 = vrot.slane %v791_v44, 2  ;;  %v868_v63 = vsel %vm42_vm1, %v766_v26, -inf }
  0xf7   :  { %v557_v39 = vpop.f32.mrf.mxu1  ;;  %994 = vmatpush.msrb.mxu3 %v969_v35  ;;  %v91_v35 = vld [vmem:[#allocation2 + $0x78] sm:$0xff] }
  0xf8   :  { %v558_v43 = vadd.f32 %v557_v39, %v468_v37  ;;  %v638_v45 = vadd.f32 %v601_v40, %v104_v34  ;;  %v782_v34 = vmax.f32 %v780_v6, %v781_v20  ;;  %v968_v37 = vld [vmem:[%s1978_s6 + $0x18] sm:$0xff]  ;;  %v723_v39 = vadd.f32 %v1794_v36, %v687_v25 }
  0xf9   :  { %v797_v40 = vsel %vm42_vm1, %v751_v22, -inf  ;;  %1055 = vmatpush.msra.mxu2 %v968_v37  ;;  %v700_v22 = vld [vmem:[#allocation2 + $0xb0] sm:$0xff]  ;;  %v793_v31 = vmax.f32 %v791_v44, %v792_v7 }
  0xfa   :  { %v621_v47 = vadd.f32 %v558_v43, %v87_v38  ;;  %671 = vst.msk [vmem:[#allocation2 + $0xe0] sm:$0xff] %vm42_vm1, %v638_v45  ;;  %v720_v38 = vadd.f32 %v1794_v36, %v684_v24  ;;  %v699_v45 = vld [vmem:[#allocation2 + $0xa8] sm:$0xff]  ;;  %v798_v62 = vmax.f32 %v796_v56, %v797_v40  ;;  %v755_v4 = vmax.f32 %v723_v39, 0.0 }
  0xfb   :  { %v688_v43 = vld [vmem:[#allocation2 + $0x50] sm:$0xff]  ;;  %1056 = vmatpush.msra.mxu2 %v967_v42  ;;  %v735_v8 = vadd.f32 %v1794_v36, %v699_v45  ;;  %v736_v40 = vadd.f32 %v1794_v36, %v700_v22 }
  0xfc   :  { %654 = vst.msk [vmem:[#allocation2 + $0x58] sm:$0xff] %vm42_vm1, %v621_v47  ;;  %v513_v52 = vpop.f32.mrf.mxu2  ;;  %v764_v47 = vmax.f32 %v1811_v27, 0.0  ;;  %v752_v3 = vmax.f32 %v720_v38, 0.0 }
  0xfd   :  { %v602_v54 = vpop.f32.mrf.mxu3  ;;  %1057 = vmatpush.msra.mxu2 %v966_v51 }
  0xfe   :  { %v471_v57 = vpop.f32.mrf.mxu0  ;;  %v603_v60 = vadd.f32 %v602_v54, %v513_v52  ;;  %v805_v20 = vsel %vm42_vm1, %v752_v3, -inf  ;;  %v859_v56 = vsel %vm42_vm1, %v764_v47, -inf }
  0xff   :  { %v560_v59 = vpop.f32.mrf.mxu1  ;;  %1058 = vmatpush.msra.mxu2 %v965_v1 }
 0x100   :  { %v561_v61 = vadd.f32 %v560_v59, %v471_v57  ;;  %v639_v0 = vadd.f32 %v603_v60, %v105_v53  ;;  %v722_v53 = vadd.f32 %v1794_v36, %v686_v32 }
 0x102   :  { %v622_v2 = vadd.f32 %v561_v61, %v88_v58  ;;  %672 = vst.msk [vmem:[#allocation2 + $0xe8] sm:$0xff] %vm42_vm1, %v639_v0  ;;  %v90_v58 = vld [vmem:[#allocation2 + $0x70] sm:$0xff]  ;;  %v783_v61 = vrot.slane %v782_v34, 2 }
 0x103   :  { %v689_v33 = vld [vmem:[#allocation2 + $0x58] sm:$0xff] }
 0x104   :  { %655 = vst.msk [vmem:[#allocation2 + $0x60] sm:$0xff] %vm42_vm1, %v622_v2  ;;  %v516_v10 = vpop.f32.mrf.mxu2  ;;  %v725_v54 = vadd.f32 %v1794_v36, %v689_v33  ;;  %v724_v2 = vadd.f32 %v1794_v36, %v688_v43 }
 0x105   :  { %v605_v12 = vpop.f32.mrf.mxu3 }
 0x106   :  { %v473_v15 = vpop.f32.mrf.mxu0  ;;  %v606_v18 = vadd.f32 %v605_v12, %v516_v10  ;;  %v754_v10 = vmax.f32 %v722_v53, 0.0  ;;  %v806_v12 = vsel %vm42_vm1, %v753_v55, -inf  ;;  %v756_v19 = vmax.f32 %v724_v2, 0.0  ;;  %v703_v55 = vld [vmem:[#allocation2 + $0xc8] sm:$0xff] }
 0x107   :  { %v562_v17 = vpop.f32.mrf.mxu1  ;;  %v807_v25 = vmax.f32 %v805_v20, %v806_v12  ;;  %v739_v3 = vadd.f32 %v1794_v36, %v703_v55 }
 0x108   :  { %v563_v21 = vadd.f32 %v562_v17, %v473_v15  ;;  %v640_v23 = vadd.f32 %v606_v18, %v106_v11  ;;  %v757_v11 = vmax.f32 %v725_v54, 0.0  ;;  %v784_v15 = vmax.f32 %v782_v34, %v783_v61  ;;  %v702_v54 = vld [vmem:[#allocation2 + $0xc0] sm:$0xff] }
 0x109   :  { %v765_v17 = vmax.f32 %v1829_v46, 0.0  ;;  %v814_v32 = vsel %vm42_vm1, %v754_v10, -inf  ;;  %v823_v45 = vsel %vm42_vm1, %v756_v19, -inf  ;;  %v738_v47 = vadd.f32 %v1794_v36, %v702_v54 }
 0x10a   :  { %v623_v28 = vadd.f32 %v563_v21, %v89_v16  ;;  %673 = vst.msk [vmem:[#allocation2 + $0xf0] sm:$0xff] %vm42_vm1, %v640_v23  ;;  %v799_v16 = vrot.slane %v798_v62, 4  ;;  %v815_v21 = vsel %vm42_vm1, %v755_v4, -inf  ;;  %v701_v23 = vld [vmem:[#allocation2 + $0xb8] sm:$0xff]  ;;  %v824_v33 = vsel %vm42_vm1, %v757_v11, -inf }
 0x10b   :  { %v690_v52 = vld [vmem:[#allocation2 + $0x60] sm:$0xff]  ;;  %v816_v39 = vmax.f32 %v814_v32, %v815_v21  ;;  %v737_v41 = vadd.f32 %v1794_v36, %v701_v23  ;;  %v770_v21 = vmax.f32 %v738_v47, 0.0  ;;  %v771_v22 = vmax.f32 %v739_v3, 0.0 }
 0x10c   :  { %656 = vst.msk [vmem:[#allocation2 + $0x68] sm:$0xff] %vm42_vm1, %v623_v28  ;;  %v518_v48 = vpop.f32.mrf.mxu2  ;;  %v726_v6 = vadd.f32 %v1794_v36, %v690_v52  ;;  %v767_v28 = vmax.f32 %v735_v8, 0.0  ;;  %v800_v43 = vmax.f32 %v798_v62, %v799_v16  ;;  %v785_v52 = vrot.slane %v784_v15, 1  ;;  %v92_v8 = vld [vmem:[#allocation2 + $0x80] sm:$0xff] }
 0x10d   :  { %v607_v50 = vpop.f32.mrf.mxu3  ;;  %v769_v62 = vmax.f32 %v737_v41, 0.0 }
 0x10e   :  { %v476_v57 = vpop.f32.mrf.mxu0  ;;  %v608_v60 = vadd.f32 %v607_v50, %v518_v48  ;;  %v758_v24 = vmax.f32 %v726_v6, 0.0  ;;  %v808_v48 = vrot.slane %v807_v25, 4  ;;  %v801_v61 = vrot.slane %v800_v43, 2 }
 0x10f   :  { %v565_v59 = vpop.f32.mrf.mxu1  ;;  %v786_v4 = vmax.f32 %v784_v15, %v785_v52  ;;  %v878_v15 = vsel %vm42_vm1, %v769_v62, -inf  ;;  %v93_v52 = vld [vmem:[#allocation2 + $0x88] sm:$0xff] }
 0x110   :  { %v566_v0 = vadd.f32 %v565_v59, %v476_v57  ;;  %v641_v5 = vadd.f32 %v608_v60, %v107_v49  ;;  %v825_v49 = vmax.f32 %v823_v45, %v824_v33  ;;  %v832_v50 = vsel %vm42_vm1, %v758_v24, -inf }
 0x111   :  { %v794_v57 = vrot.slane %v793_v31, 1  ;;  %v768_v59 = vmax.f32 %v736_v40, 0.0  ;;  %v860_v60 = vsel %vm42_vm1, %v765_v17, -inf  ;;  %v809_v2 = vmax.f32 %v807_v25, %v808_v48 }
 0x112   :  { %v624_v9 = vadd.f32 %v566_v0, %v90_v58  ;;  %674 = vst.msk [vmem:[#allocation2 + $0xf8] sm:$0xff] %vm42_vm1, %v641_v5  ;;  %v817_v58 = vrot.slane %v816_v39, 4  ;;  %v869_v0 = vsel %vm42_vm1, %v767_v28, -inf  ;;  %v826_v27 = vrot.slane %v825_v49, 4 }
 0x113   :  { %v691_v14 = vld [vmem:[#allocation2 + $0x68] sm:$0xff]  ;;  %v1878_v6 = vmax.f32 %v859_v56, %v860_v60  ;;  %v795_v10 = vmax.f32 %v793_v31, %v794_v57  ;;  %v1880_v12 = vmax.f32 %v868_v63, %v869_v0  ;;  %v810_v19 = vrot.slane %v809_v2, 2 }
 0x114   :  { %657 = vst.msk [vmem:[#allocation2 + $0x70] sm:$0xff] %vm42_vm1, %v624_v9  ;;  %v727_v18 = vadd.f32 %v1794_v36, %v691_v14  ;;  %v957_v29 = vpop.f32.mrf.mxu2  ;;  %v818_v11 = vmax.f32 %v816_v39, %v817_v58  ;;  %v877_v14 = vsel %vm42_vm1, %v768_v59, -inf  ;;  %v827_v20 = vmax.f32 %v825_v49, %v826_v27  ;;  %v708_v39 = vld [vmem:[#allocation2 + $0xf0] sm:$0xff] }
 0x115   :  { %v958_v38 = vadd.f32 %v1852_v13, %v957_v29  ;;  %v1888_v28 = vsel %vm1018_vm3, %v795_v10, %v786_v4  ;;  %v704_v29 = vld [vmem:[#allocation2 + $0xd0] sm:$0xff]  ;;  %v862_v31 = vrot.slane %v1878_v6, 4  ;;  %v871_v32 = vrot.slane %v1880_v12, 4 }
 0x116   :  { %v759_v30 = vmax.f32 %v727_v18, 0.0  ;;  %v478_v34 = vpop.f32.mrf.mxu0  ;;  %v1884_v18 = vmax.f32 %v800_v43, %v801_v61  ;;  %v819_v26 = vrot.slane %v818_v11, 2  ;;  %v1895_v40 = vmax.f32 %v877_v14, %v878_v15 }
 0x117   :  { %v567_v37 = vpop.f32.mrf.mxu1  ;;  %v963_v46 = vmax.f32 %v958_v38, 0.0  ;;  %v707_v38 = vld [vmem:[#allocation2 + $0xe8] sm:$0xff]  ;;  %v811_v41 = vmax.f32 %v809_v2, %v810_v19  ;;  %v886_v45 = vsel %vm42_vm1, %v770_v21, -inf  ;;  %v740_v49 = vadd.f32 %v1794_v36, %v704_v29 }
 0x118   :  { %v568_v42 = vadd.f32 %v567_v37, %v478_v34  ;;  %v833_v44 = vsel %vm42_vm1, %v759_v30, -inf  ;;  %v705_v30 = vld [vmem:[#allocation2 + $0xd8] sm:$0xff]  ;;  %v706_v37 = vld [vmem:[#allocation2 + $0xe0] sm:$0xff]  ;;  %v820_v54 = vmax.f32 %v818_v11, %v819_v26  ;;  %v743_v56 = vadd.f32 %v1794_v36, %v707_v38 }
 0x119   :  { %v834_v53 = vmax.f32 %v832_v50, %v833_v44  ;;  %1334 = vmatmul.msk.f32.vlgmr.msrb.gmra.mxu3 %vm42_vm1, %v963_v46  ;;  %v709_v43 = vld [vmem:[#allocation2 + $0xf8] sm:$0xff]  ;;  %v887_v44 = vsel %vm42_vm1, %v771_v22, -inf  ;;  %v741_v50 = vadd.f32 %v1794_v36, %v705_v30  ;;  %v742_v55 = vadd.f32 %v1794_v36, %v706_v37 }
 0x11a   :  { %v625_v51 = vadd.f32 %v568_v42, %v91_v35  ;;  %v803_v35 = vrot.slane %v1884_v18, 1  ;;  %v828_v42 = vrot.slane %v827_v20, 2  ;;  %v744_v57 = vadd.f32 %v1794_v36, %v708_v39 }
 0x11b   :  { %v692_v1 = vld [vmem:[#allocation2 + $0x70] sm:$0xff]  ;;  %v835_v5 = vrot.slane %v834_v53, 4  ;;  %v745_v62 = vadd.f32 %v1794_v36, %v709_v43  ;;  %v812_v63 = vrot.slane %v811_v41, 1  ;;  %v772_v3 = vmax.f32 %v740_v49, 0.0 }
 0x11c   :  { %658 = vst.msk [vmem:[#allocation2 + $0x78] sm:$0xff] %vm42_vm1, %v625_v51  ;;  %v728_v17 = vadd.f32 %v1794_v36, %v692_v1  ;;  %v960_v61 = vpop.f32.mrf.mxu2  ;;  %v829_v0 = vmax.f32 %v827_v20, %v828_v42  ;;  %v773_v4 = vmax.f32 %v741_v50, 0.0  ;;  %v821_v10 = vrot.slane %v820_v54, 1 }
 0x11d   :  { %v836_v24 = vmax.f32 %v834_v53, %v835_v5  ;;  %v961_v2 = vadd.f32 %v1852_v13, %v960_v61  ;;  %v776_v11 = vmax.f32 %v744_v57, 0.0  ;;  %v777_v14 = vmax.f32 %v745_v62, 0.0 }
 0x11e   :  { %v481_v7 = vpop.f32.mrf.mxu0  ;;  %v760_v34 = vmax.f32 %v728_v17, 0.0  ;;  %v804_v17 = vmax.f32 %v1884_v18, %v803_v35  ;;  %v830_v15 = vrot.slane %v829_v0, 1  ;;  %v888_v21 = vmax.f32 %v886_v45, %v887_v44 }
 0x11f   :  { %v570_v9 = vpop.f32.mrf.mxu1  ;;  %v837_v48 = vrot.slane %v836_v24, 2  ;;  %v895_v22 = vsel %vm42_vm1, %v772_v3, -inf  ;;  %v822_v30 = vmax.f32 %v820_v54, %v821_v10  ;;  %v872_v57 = vmax.f32 %v1880_v12, %v871_v32 }
 0x120   :  { %v571_v16 = vadd.f32 %v570_v9, %v481_v7  ;;  %v841_v59 = vsel %vm42_vm1, %v760_v34, -inf  ;;  %v964_v7 = vmax.f32 %v961_v2, 0.0  ;;  %v775_v9 = vmax.f32 %v743_v56, 0.0 }
 0x121   :  { %v838_v47 = vmax.f32 %v836_v24, %v837_v48  ;;  %v813_v24 = vmax.f32 %v811_v41, %v812_v63  ;;  %v914_v34 = vsel %vm42_vm1, %v777_v14, -inf  ;;  %v831_v35 = vmax.f32 %v829_v0, %v830_v15 }
 0x122   :  { %v626_v23 = vadd.f32 %v571_v16, %v92_v8  ;;  %v774_v8 = vmax.f32 %v742_v55, 0.0  ;;  %v880_v16 = vrot.slane %v1895_v40, 4  ;;  %1335 = vmatmul.msk.f32.gmra.mxu3 %vm42_vm1, %v964_v7  ;;  %v905_v29 = vsel %vm42_vm1, %v775_v9, -inf }
 0x123   :  { %v693_v25 = vld [vmem:[#allocation2 + $0x78] sm:$0xff]  ;;  %v839_v20 = vrot.slane %v838_v47, 1  ;;  %v1021_v38 = vsel %vm1020_vm4, %v804_v17, %v1888_v28  ;;  %v889_v41 = vrot.slane %v888_v21, 4 }
 0x124   :  { %659 = vst.msk [vmem:[#allocation2 + $0x80] sm:$0xff] %vm42_vm1, %v626_v23  ;;  %v729_v33 = vadd.f32 %v1794_v36, %v693_v25  ;;  %v896_v23 = vsel %vm42_vm1, %v773_v4, -inf  ;;  %v904_v26 = vsel %vm42_vm1, %v774_v8, -inf  ;;  %v1023_v44 = vsel %vm1022_vm5, %v813_v24, %v1021_v38 }
 0x125   :  { %v897_v39 = vmax.f32 %v895_v22, %v896_v23  ;;  %v840_v42 = vmax.f32 %v838_v47, %v839_v20  ;;  %v906_v43 = vmax.f32 %v904_v26, %v905_v29  ;;  %v1025_v49 = vsel %vm1024_vm6, %v822_v30, %v1023_v44 }
 0x126   :  { %v761_v46 = vmax.f32 %v729_v33, 0.0  ;;  %v483_v51 = vpop.f32.mrf.mxu0  ;;  %v913_v33 = vsel %vm42_vm1, %v776_v11, -inf  ;;  %v1027_v28 = vsel %vm1026_vm7, %v831_v35, %v1025_v49  ;;  %v1075_v49 = vld [vmem:[%s1981_s9 + $0x8] sm:$0xff] }
 0x127   :  { %v572_v53 = vpop.f32.mrf.mxu1  ;;  %v915_v48 = vmax.f32 %v913_v33, %v914_v34  ;;  %v898_v54 = vrot.slane %v897_v39, 4  ;;  %v1029_v55 = vsel %vm1028_vm8, %v840_v42, %v1027_v28 }
 0x128   :  { %v573_v58 = vadd.f32 %v572_v53, %v483_v51  ;;  %v842_v60 = vsel %vm42_vm1, %v761_v46, -inf  ;;  %v863_v53 = vmax.f32 %v1878_v6, %v862_v31  ;;  %v890_v31 = vmax.f32 %v888_v21, %v889_v41 }
 0x129   :  { %v843_v1 = vmax.f32 %v841_v59, %v842_v60  ;;  %v916_v60 = vrot.slane %v915_v48, 4  ;;  %v899_v0 = vmax.f32 %v897_v39, %v898_v54 }
 0x12a   :  { %v627_v27 = vadd.f32 %v573_v58, %v93_v52  ;;  %v907_v58 = vrot.slane %v906_v43, 4  ;;  %v864_v63 = vrot.slane %v863_v53, 2  ;;  %v891_v47 = vrot.slane %v890_v31, 2 }
 0x12b   :  { %v844_v5 = vrot.slane %v843_v1, 4  ;;  %v694_v13 = vld [vmem:[#allocation2 + $0x80] sm:$0xff]  ;;  %v917_v32 = vmax.f32 %v915_v48, %v916_v60  ;;  %v1076_v48 = vld [vmem:[%s1981_s9 + $0x10] sm:$0xff] }
 0x12c   :  { %660 = vst.msk [vmem:[#allocation2 + $0x88] sm:$0xff] %vm42_vm1, %v627_v27  ;;  %v730_v18 = vadd.f32 %v1794_v36, %v694_v13  ;;  %v908_v2 = vmax.f32 %v906_v43, %v907_v58  ;;  %v865_v4 = vmax.f32 %v863_v53, %v864_v63  ;;  %v892_v11 = vmax.f32 %v890_v31, %v891_v47  ;;  %v1408_v60 = vld [vmem:[%s1980_s10] ss:$0 sm:$0xff] }
 0x12d   :  { %v845_v19 = vmax.f32 %v843_v1, %v844_v5  ;;  %v873_v1 = vrot.slane %v872_v57, 2  ;;  %v918_v10 = vrot.slane %v917_v32, 2 }
 0x12e   :  { %v762_v51 = vmax.f32 %v730_v18, 0.0  ;;  %v909_v7 = vrot.slane %v908_v2, 2  ;;  %v893_v22 = vrot.slane %v892_v11, 1 }
 0x12f   :  { %v846_v25 = vrot.slane %v845_v19, 2  ;;  %v874_v5 = vmax.f32 %v872_v57, %v873_v1  ;;  %v919_v21 = vmax.f32 %v917_v32, %v918_v10 }
 0x130   :  { %v850_v61 = vsel %vm42_vm1, %v762_v51, -inf  ;;  %v894_v34 = vmax.f32 %v892_v11, %v893_v22 }
 0x131   :  { %v847_v37 = vmax.f32 %v845_v19, %v846_v25  ;;  %v875_v15 = vrot.slane %v874_v5, 1  ;;  %v910_v19 = vmax.f32 %v908_v2, %v909_v7  ;;  %v920_v18 = vrot.slane %v919_v21, 1 }
 0x133   :  { %v848_v45 = vrot.slane %v847_v37, 1  ;;  %v695_v46 = vld [vmem:[#allocation2 + $0x88] sm:$0xff]  ;;  %v876_v26 = vmax.f32 %v874_v5, %v875_v15  ;;  %v911_v29 = vrot.slane %v910_v19, 1  ;;  %v921_v41 = vmax.f32 %v919_v21, %v920_v18 }
 0x134   :  { %v731_v50 = vadd.f32 %v1794_v36, %v695_v46  ;;  %v881_v36 = vmax.f32 %v1895_v40, %v880_v16  ;;  %v900_v40 = vrot.slane %v899_v0, 2  ;;  %v866_v16 = vrot.slane %v865_v4, 1  ;;  %v1077_v46 = vld [vmem:[%s1981_s9 + $0x18] sm:$0xff] }
 0x135   :  { %v849_v52 = vmax.f32 %v847_v37, %v848_v45  ;;  %v912_v39 = vmax.f32 %v910_v19, %v911_v29  ;;  %1100 = vmatpush.msra.mxu3 %v1077_v46 }
 0x136   :  { %v763_v56 = vmax.f32 %v731_v50, 0.0  ;;  %v882_v12 = vrot.slane %v881_v36, 2  ;;  %v901_v17 = vmax.f32 %v899_v0, %v900_v40  ;;  %v867_v24 = vmax.f32 %v865_v4, %v866_v16  ;;  %v1074_v50 = vld [vmem:[%s1981_s9] sm:$0xff] }
 0x137   :  { %v1031_v59 = vsel %vm1030_vm9, %v849_v52, %v1029_v55  ;;  %1101 = vmatpush.msra.mxu3 %v1076_v48  ;;  %v1407_v52 = vld [vmem:[%s1979_s8] ss:$0 sm:$0xff] }
 0x138   :  { %1336 = vmatmul.msk.f32.vlgmr.msra.gmra.mxu2 %vm42_vm1, %v1031_v59  ;;  %v851_v6 = vsel %vm42_vm1, %v763_v56, -inf  ;;  %v883_v9 = vmax.f32 %v881_v36, %v882_v12  ;;  %v902_v25 = vrot.slane %v901_v17, 1 }
 0x139   :  { %v852_v62 = vmax.f32 %v850_v61, %v851_v6  ;;  %1102 = vmatpush.msra.mxu3 %v1075_v49 }
 0x13a   :  { %v884_v20 = vrot.slane %v883_v9, 1  ;;  %v903_v37 = vmax.f32 %v901_v17, %v902_v25 }
 0x13b   :  { %v853_v27 = vrot.slane %v852_v62, 4  ;;  %1103 = vmatpush.msra.mxu3 %v1074_v50 }
 0x13c   :  { %v885_v30 = vmax.f32 %v883_v9, %v884_v20 }
 0x13d   :  { %v854_v3 = vmax.f32 %v852_v62, %v853_v27 }
 0x13f   :  { %v855_v8 = vrot.slane %v854_v3, 2 }
 0x141   :  { %v856_v14 = vmax.f32 %v854_v3, %v855_v8 }
 0x143   :  { %v857_v13 = vrot.slane %v856_v14, 1 }
 0x145   :  { %v858_v23 = vmax.f32 %v856_v14, %v857_v13 }
 0x147   :  { %v1032_v33 = vsel %vm1018_vm3, %v867_v24, %v858_v23 }
 0x148   :  { %v1033_v35 = vsel %vm1020_vm4, %v876_v26, %v1032_v33 }
 0x149   :  { %v1034_v38 = vsel %vm1022_vm5, %v885_v30, %v1033_v35 }
 0x14a   :  { %v1035_v42 = vsel %vm1024_vm6, %v894_v34, %v1034_v38 }
 0x14b   :  { %v1036_v43 = vsel %vm1026_vm7, %v903_v37, %v1035_v42 }
 0x14c   :  { %v1037_v45 = vsel %vm1028_vm8, %v912_v39, %v1036_v43 }
 0x14d   :  { %v1038_v44 = vsel %vm1030_vm9, %v921_v41, %v1037_v45 }
 0x14e   :  { %1337 = vmatmul.msk.f32.gmra.mxu2 %vm42_vm1, %v1038_v44 }
 0x19c   :  { %v996_v51 = vpop.f32.mrf.mxu3 }
 0x1a5   :  { %v999_v56 = vpop.f32.mrf.mxu3 }
 0x1bb   :  { %v1060_v28 = vpop.f32.mrf.mxu2 }
 0x1bc   :  { %v1061_v53 = vadd.f32 %v1060_v28, %v996_v51 }
 0x1be   :  { %v1070_v54 = vadd.f32 %v1407_v52, %v1061_v53 }
 0x1c0   :  { %v1072_v55 = vmax.f32 %v1070_v54, 0.0 }
 0x1c2   :  { %1338 = vmatmul.msk.f32.vlgmr.msra.gmra.mxu3 %vm42_vm1, %v1072_v55 }
 0x1d1   :  { %v1063_v57 = vpop.f32.mrf.mxu2 }
 0x1d2   :  { %v1064_v58 = vadd.f32 %v1063_v57, %v999_v56 }
 0x1d4   :  { %v1071_v59 = vadd.f32 %v1407_v52, %v1064_v58 }
 0x1d6   :  { %v1073_v36 = vmax.f32 %v1071_v59, 0.0 }
 0x1d8   :  { %1339 = vmatmul.msk.f32.gmra.mxu3 %vm42_vm1, %v1073_v36 }
 0x245   :  { %v1105_v61 = vpop.f32.mrf.mxu3 }
 0x246   :  { %v1106_v6 = vadd.f32 %v1408_v60, %v1105_v61 }
 0x248   :  { %1111 = vmax.xlane.f32.xlu0 %v1106_v6 }
 0x25b   :  { %v1108_v31 = vpop.f32.mrf.mxu3 }
 0x25c   :  { %v1109_v62 = vadd.f32 %v1408_v60, %v1108_v31 }
 0x25e   :  { %1113 = vmax.xlane.f32.xlu0 %v1109_v62 }
 0x2bb   :  { %v1112_v63 = vpop.xlane.xlu0 %1111 }
 0x2bc   :  { %v1115_v0 = vsub.f32 %v1106_v6, %v1112_v63 }
 0x2be   :  { %v1117_v1 = vmul.f32 1.442695, %v1115_v0 }
 0x2c0   :  { %1409 = vpow2.f32 %v1117_v1 }
 0x2c6   :  { %v1410_v2 = vpop.eup %1409 }
 0x2c7   :  { %1121 = vadd.xlane.f32.xlu1 %v1410_v2 }
 0x2d1   :  { %v1114_v27 = vpop.xlane.xlu0 %1113 }
 0x2d2   :  { %v1116_v12 = vsub.f32 %v1109_v62, %v1114_v27 }
 0x2d4   :  { %v1119_v32 = vmul.f32 1.442695, %v1116_v12 }
 0x2d6   :  { %1411 = vpow2.f32 %v1119_v32 }
 0x2dc   :  { %v1412_v47 = vpop.eup %1411 }
 0x2dd   :  { %1123 = vadd.xlane.f32.xlu1 %v1412_v47 }
 0x33a   :  { %v1122_v3 = vpop.xlane.xlu1 %1121 }
 0x33b   :  { %1413 = vlog2.f32 %v1122_v3 }
 0x341   :  { %v1414_v4 = vpop.eup %1413 }
 0x342   :  { %v1126_v40 = vmul.f32 0.6931472, %v1414_v4 }
 0x344   :  { %v1129_v5 = vsub.f32 %v1115_v0, %v1126_v40 }
 0x346   :  { %1131 = vst [vmem:[%s1982_s11] sm:$0xff] %v1129_v5 }
 0x350   :  { %v1124_v7 = vpop.xlane.xlu1 %1123 }
 0x351   :  { %1415 = vlog2.f32 %v1124_v7 }
 0x357   :  { %v1416_v8 = vpop.eup %1415 }
 0x358   :  { %v1128_v9 = vmul.f32 0.6931472, %v1416_v8 }
 0x35a   :  { %v1130_v10 = vsub.f32 %v1116_v12, %v1128_v9 }
 0x35c   :  { %1132 = vst [vmem:[%s1982_s11 + $0x8] sm:$0xff] %v1130_v10 }

</bundles_post_ra>
